<compile_context>
chip_gen: v5e
topology: v5e:2x2
jax: 0.10.0
libtpu: 0.0.40
codegen_flags: <defaults>
</compile_context>

<pallas_src>
import jax
import jax.numpy as jnp
from jax import lax
from jax.experimental import pallas as pl
from jax.experimental.pallas import tpu as pltpu

EPS = 1e-5


def _round_up(n, m):
    return ((n + m - 1) // m) * m


# ---------------------------------------------------------------------------
# Kernel 1 (one-shot, tiny): beta = sigmoid(InstanceNorm1d(fc2(fc1(x))))
# ---------------------------------------------------------------------------
def beta_kernel(x_ref, w1t_ref, b1_ref, w2t_ref, b2_ref, beta_ref):
    # x_ref: (1, W)   w1t_ref: (W, H)  b1_ref: (1, H)
    # w2t_ref: (H, W) b2_ref: (1, W)   beta_ref: (1, W)
    x = x_ref[...].astype(jnp.float32)
    y = jnp.dot(x, w1t_ref[...], preferred_element_type=jnp.float32) + b1_ref[...]
    z = jnp.dot(y, w2t_ref[...], preferred_element_type=jnp.float32) + b2_ref[...]
    # InstanceNorm1d over width (biased variance, eps=1e-5, no affine)
    mean = jnp.mean(z, axis=-1, keepdims=True)
    zc = z - mean
    var = jnp.mean(zc * zc, axis=-1, keepdims=True)
    beta_ref[...] = jax.nn.sigmoid(zc * lax.rsqrt(var + EPS))


# ---------------------------------------------------------------------------
# Kernel 2 (tiled hot path):
#   out[c, j] = d * sigmoid(beta[j] * d) + p2[c] * x[j],  d = (p1[c]-p2[c]) * x[j]
# ---------------------------------------------------------------------------
def acon_tile_kernel(x_ref, beta_ref, dp_ref, p2_ref, o_ref):
    # x_ref/beta_ref: (1, Wp) resident rows; dp_ref/p2_ref: (TILE_R, 1) per-tile
    # columns; o_ref: (TILE_R, Wp) lane-dense output block.
    x = x_ref[...]
    beta = beta_ref[...]
    dp = dp_ref[...]
    p2 = p2_ref[...]
    d = dp * x                                             # (TILE_R, Wp)
    o_ref[...] = d * jax.nn.sigmoid(beta * d) + p2 * x     # (TILE_R, Wp)


def meta_aconc_pallas(x, params, active=None, *, row_tile_budget_bytes=2 * 1024 * 1024):
    """x: (width,) float32. Returns (1, width, 1, width) like the PyTorch module."""
    del active  # unused by the reference forward
    w1, b1, w2, b2, p1, p2 = params
    width = x.shape[0]
    hidden = w1.shape[0]

    # ---- beta: small one-shot Pallas call (unpadded so mean/var are exact) ----
    x2 = x.reshape(1, width).astype(jnp.float32)
    w1t = w1.reshape(hidden, width).T           # (W, H)
    b1r = b1.reshape(1, hidden)
    w2t = w2.reshape(width, hidden).T           # (H, W)
    b2r = b2.reshape(1, width)

    vmem = pl.BlockSpec(memory_space=pltpu.MemorySpace.VMEM)
    beta = pl.pallas_call(
        beta_kernel,
        out_shape=jax.ShapeDtypeStruct((1, width), jnp.float32),
        in_specs=[vmem] * 5,
        out_specs=vmem,
    )(x2, w1t, b1r, w2t, b2r)

    # ---- tiled elementwise hot path ----
    w_pad = _round_up(width, 128)                       # lane-dense output last dim
    tile_r = max(8, (row_tile_budget_bytes // (w_pad * 4)) // 8 * 8)
    tile_r = min(tile_r, _round_up(width, 8))           # multiple of 8, <= row count
    rows_pad = _round_up(width, tile_r)
    grid_r = rows_pad // tile_r

    x_row = jnp.zeros((1, w_pad), jnp.float32).at[:, :width].set(x2)
    beta_row = jnp.zeros((1, w_pad), jnp.float32).at[:, :width].set(beta)
    dp_col = jnp.zeros((rows_pad, 1), jnp.float32).at[:width, 0].set(
        (p1 - p2).reshape(width))
    p2_col = jnp.zeros((rows_pad, 1), jnp.float32).at[:width, 0].set(
        p2.reshape(width))

    out_pad = pl.pallas_call(
        acon_tile_kernel,
        out_shape=jax.ShapeDtypeStruct((rows_pad, w_pad), jnp.float32),
        grid=(grid_r,),
        in_specs=[
            pl.BlockSpec((1, w_pad), lambda i: (0, 0)),       # x (resident)
            pl.BlockSpec((1, w_pad), lambda i: (0, 0)),       # beta (resident)
            pl.BlockSpec((tile_r, 1), lambda i: (i, 0)),      # p1 - p2 column tile
            pl.BlockSpec((tile_r, 1), lambda i: (i, 0)),      # p2 column tile
        ],
        out_specs=pl.BlockSpec((tile_r, w_pad), lambda i: (i, 0)),
        compiler_params=pltpu.CompilerParams(
            dimension_semantics=("parallel",),                # megacore / v7x 2 TCs
            vmem_limit_bytes=32 * 1024 * 1024,
        ),
    )(x_row, beta_row, dp_col, p2_col)

    return out_pad[:width, :width].reshape(1, width, 1, width)


def meta_aconc_ref(x, params):
    """Pure-JAX reference mirroring the PyTorch forward."""
    w1, b1, w2, b2, p1, p2 = params
    width = x.shape[0]
    hidden = w1.shape[0]
    y = w1.reshape(hidden, width) @ x + b1
    z = w2.reshape(width, hidden) @ y + b2
    zn = (z - jnp.mean(z)) / jnp.sqrt(jnp.var(z) + EPS)
    beta = jax.nn.sigmoid(zn)                                  # (W,)
    xb = x.reshape(1, 1, 1, width)
    bb = beta.reshape(1, 1, 1, width)
    d = (p1 - p2) * xb
    return d * jax.nn.sigmoid(bb * d) + p2 * xb


def init_params(key, width, r=16):
    hidden = max(r, width // r)
    ks = jax.random.split(key, 6)
    w1 = jax.random.normal(ks[0], (hidden, width, 1, 1), jnp.float32) * 0.1   # fc1 weight
    b1 = jax.random.normal(ks[1], (hidden,), jnp.float32) * 0.1               # fc1 bias
    w2 = jax.random.normal(ks[2], (width, hidden, 1, 1), jnp.float32) * 0.1   # fc2 weight
    b2 = jax.random.normal(ks[3], (width,), jnp.float32) * 0.1                # fc2 bias
    p1 = jax.random.normal(ks[4], (1, width, 1, 1), jnp.float32)              # p1
    p2 = jax.random.normal(ks[5], (1, width, 1, 1), jnp.float32)              # p2
    # bn1 exists in __init__ but is never used in forward -> omitted.
    return (w1, b1, w2, b2, p1, p2)


if __name__ == "__main__":
    width, r = 64, 16
    key = jax.random.PRNGKey(0)
    kx, kp = jax.random.split(key)
    x = jax.random.normal(kx, (width,), jnp.float32)
    params = init_params(kp, width, r)

    fwd = jax.jit(lambda xx, pp: meta_aconc_pallas(xx, pp, active=True))
    out = jax.block_until_ready(fwd(x, params))

    ref = meta_aconc_ref(x, params)
    assert out.shape == (1, width, 1, width)
    assert jnp.allclose(out, ref, atol=1e-5, rtol=1e-5)

    print("KERNEL_OK")
</pallas_src>

<mosaic_0001>
module attributes {stable_mosaic.version = 11 : i64} {
  func.func @beta_kernel(%arg0: memref<1x64xf32, #tpu.memory_space<vmem>>, %arg1: memref<64x16xf32, #tpu.memory_space<vmem>>, %arg2: memref<1x16xf32, #tpu.memory_space<vmem>>, %arg3: memref<16x64xf32, #tpu.memory_space<vmem>>, %arg4: memref<1x64xf32, #tpu.memory_space<vmem>>, %arg5: memref<1x64xf32, #tpu.memory_space<vmem>>) attributes {dimension_semantics = [], scalar_prefetch = 0 : i64, scratch_operands = 0 : i64, tpu.core_type = #tpu.core_type<tc>} {
    %c0 = arith.constant 0 : index
    %c0_0 = arith.constant 0 : index
    %0 = vector.load %arg0[%c0, %c0_0] : memref<1x64xf32, #tpu.memory_space<vmem>>, vector<1x64xf32>
    %c0_1 = arith.constant 0 : index
    %c0_2 = arith.constant 0 : index
    %1 = vector.load %arg1[%c0_1, %c0_2] : memref<64x16xf32, #tpu.memory_space<vmem>>, vector<64x16xf32>
    %cst = arith.constant dense<0.000000e+00> : vector<1x16xf32>
    %2 = tpu.matmul %0, %1, %cst {dimension_numbers = #tpu.dot_dimension_numbers<[1], [0], [0], [1], [0, 0, 1, 1], [], []>} : vector<1x64xf32>, vector<64x16xf32>, vector<1x16xf32> -> vector<1x16xf32>
    %c0_3 = arith.constant 0 : index
    %c0_4 = arith.constant 0 : index
    %3 = vector.load %arg2[%c0_3, %c0_4] : memref<1x16xf32, #tpu.memory_space<vmem>>, vector<1x16xf32>
    %4 = arith.addf %2, %3 : vector<1x16xf32>
    %c0_5 = arith.constant 0 : index
    %c0_6 = arith.constant 0 : index
    %5 = vector.load %arg3[%c0_5, %c0_6] : memref<16x64xf32, #tpu.memory_space<vmem>>, vector<16x64xf32>
    %cst_7 = arith.constant dense<0.000000e+00> : vector<1x64xf32>
    %6 = tpu.matmul %4, %5, %cst_7 {dimension_numbers = #tpu.dot_dimension_numbers<[1], [0], [0], [1], [0, 0, 1, 1], [], []>} : vector<1x16xf32>, vector<16x64xf32>, vector<1x64xf32> -> vector<1x64xf32>
    %c0_8 = arith.constant 0 : index
    %c0_9 = arith.constant 0 : index
    %7 = vector.load %arg4[%c0_8, %c0_9] : memref<1x64xf32, #tpu.memory_space<vmem>>, vector<1x64xf32>
    %8 = arith.addf %6, %7 : vector<1x64xf32>
    %cst_10 = arith.constant dense<0.000000e+00> : vector<1xf32>
    %9 = vector.multi_reduction <add>, %8, %cst_10 [1] : vector<1x64xf32> to vector<1xf32>
    %10 = vector.shape_cast %9 : vector<1xf32> to vector<1x1xf32>
    %cst_11 = arith.constant 6.400000e+01 : f32
    %11 = vector.broadcast %cst_11 : f32 to vector<1x1xf32>
    %12 = arith.divf %10, %11 : vector<1x1xf32>
    %13 = vector.broadcast %12 : vector<1x1xf32> to vector<1x64xf32>
    %14 = arith.subf %8, %13 : vector<1x64xf32>
    %15 = arith.mulf %14, %14 : vector<1x64xf32>
    %cst_12 = arith.constant dense<0.000000e+00> : vector<1xf32>
    %16 = vector.multi_reduction <add>, %15, %cst_12 [1] : vector<1x64xf32> to vector<1xf32>
    %17 = vector.shape_cast %16 : vector<1xf32> to vector<1x1xf32>
    %cst_13 = arith.constant 6.400000e+01 : f32
    %18 = vector.broadcast %cst_13 : f32 to vector<1x1xf32>
    %19 = arith.divf %17, %18 : vector<1x1xf32>
    %cst_14 = arith.constant 9.99999974E-6 : f32
    %20 = vector.broadcast %cst_14 : f32 to vector<1x1xf32>
    %21 = arith.addf %19, %20 : vector<1x1xf32>
    %22 = math.rsqrt %21 : vector<1x1xf32>
    %23 = vector.broadcast %22 : vector<1x1xf32> to vector<1x64xf32>
    %24 = arith.mulf %14, %23 : vector<1x64xf32>
    %25 = arith.negf %24 : vector<1x64xf32>
    %26 = math.exp %25 : vector<1x64xf32>
    %cst_15 = arith.constant 1.000000e+00 : f32
    %27 = vector.broadcast %cst_15 : f32 to vector<1x64xf32>
    %28 = arith.addf %27, %26 : vector<1x64xf32>
    %29 = arith.divf %27, %28 : vector<1x64xf32>
    %c0_16 = arith.constant 0 : index
    %c0_17 = arith.constant 0 : index
    %30 = vector.load %arg5[%c0_16, %c0_17] : memref<1x64xf32, #tpu.memory_space<vmem>>, vector<1x64xf32>
    tpu.vector_store %arg5[%c0_16, %c0_17], %29 {strides = array<i32>} : memref<1x64xf32, #tpu.memory_space<vmem>>, vector<1x64xf32>,
    return
  }
}

module attributes {stable_mosaic.version = 11 : i64} {
  func.func @acon_tile_kernel(%arg0: i32, %arg1: memref<1x128xf32, #tpu.memory_space<vmem>>, %arg2: memref<1x128xf32, #tpu.memory_space<vmem>>, %arg3: memref<64x1xf32, #tpu.memory_space<vmem>>, %arg4: memref<64x1xf32, #tpu.memory_space<vmem>>, %arg5: memref<64x128xf32, #tpu.memory_space<vmem>>) attributes {dimension_semantics = [#tpu.dimension_semantics<parallel>], iteration_bounds = array<i64: 1>, scalar_prefetch = 0 : i64, scratch_operands = 0 : i64, tpu.core_type = #tpu.core_type<tc>, window_params = [{pipeline_mode = #tpu.pipeline_mode<synchronous>, transform_indices = @transform_0, window_bounds = array<i64: 1, 128>}, {pipeline_mode = #tpu.pipeline_mode<synchronous>, transform_indices = @transform_1, window_bounds = array<i64: 1, 128>}, {transform_indices = @transform_2, window_bounds = array<i64: 64, 1>}, {transform_indices = @transform_3, window_bounds = array<i64: 64, 1>}, {transform_indices = @transform_4, window_bounds = array<i64: 64, 128>}]} {
    %c0 = arith.constant 0 : index
    %c0_0 = arith.constant 0 : index
    %0 = vector.load %arg1[%c0, %c0_0] : memref<1x128xf32, #tpu.memory_space<vmem>>, vector<1x128xf32>
    %c0_1 = arith.constant 0 : index
    %c0_2 = arith.constant 0 : index
    %1 = vector.load %arg2[%c0_1, %c0_2] : memref<1x128xf32, #tpu.memory_space<vmem>>, vector<1x128xf32>
    %c0_3 = arith.constant 0 : index
    %c0_4 = arith.constant 0 : index
    %2 = vector.load %arg3[%c0_3, %c0_4] : memref<64x1xf32, #tpu.memory_space<vmem>>, vector<64x1xf32>
    %c0_5 = arith.constant 0 : index
    %c0_6 = arith.constant 0 : index
    %3 = vector.load %arg4[%c0_5, %c0_6] : memref<64x1xf32, #tpu.memory_space<vmem>>, vector<64x1xf32>
    %4 = vector.broadcast %2 : vector<64x1xf32> to vector<64x128xf32>
    %5 = vector.broadcast %0 : vector<1x128xf32> to vector<64x128xf32>
    %6 = arith.mulf %4, %5 : vector<64x128xf32>
    %7 = vector.broadcast %1 : vector<1x128xf32> to vector<64x128xf32>
    %8 = arith.mulf %7, %6 : vector<64x128xf32>
    %9 = arith.negf %8 : vector<64x128xf32>
    %10 = math.exp %9 : vector<64x128xf32>
    %cst = arith.constant 1.000000e+00 : f32
    %11 = vector.broadcast %cst : f32 to vector<64x128xf32>
    %12 = arith.addf %11, %10 : vector<64x128xf32>
    %13 = arith.divf %11, %12 : vector<64x128xf32>
    %14 = arith.mulf %6, %13 : vector<64x128xf32>
    %15 = vector.broadcast %3 : vector<64x1xf32> to vector<64x128xf32>
    %16 = vector.broadcast %0 : vector<1x128xf32> to vector<64x128xf32>
    %17 = arith.mulf %15, %16 : vector<64x128xf32>
    %18 = arith.addf %14, %17 : vector<64x128xf32>
    %c0_7 = arith.constant 0 : index
    %c0_8 = arith.constant 0 : index
    %19 = vector.load %arg5[%c0_7, %c0_8] : memref<64x128xf32, #tpu.memory_space<vmem>>, vector<64x128xf32>
    tpu.vector_store %arg5[%c0_7, %c0_8], %18 {strides = array<i32>} : memref<64x128xf32, #tpu.memory_space<vmem>>, vector<64x128xf32>,
    return
  }
  func.func @transform_0(%arg0: i32) -> (i32, i32) {
    %c0_i32 = arith.constant 0 : i32
    %c0_i32_0 = arith.constant 0 : i32
    %c0_i32_1 = arith.constant 0 : i32
    return %c0_i32, %c0_i32_0 : i32, i32
  }
  func.func @transform_1(%arg0: i32) -> (i32, i32) {
    %c0_i32 = arith.constant 0 : i32
    %c0_i32_0 = arith.constant 0 : i32
    %c0_i32_1 = arith.constant 0 : i32
    return %c0_i32, %c0_i32_0 : i32, i32
  }
  func.func @transform_2(%arg0: i32) -> (i32, i32) {
    %c0_i32 = arith.constant 0 : i32
    %c0_i32_0 = arith.constant 0 : i32
    return %arg0, %c0_i32 : i32, i32
  }
  func.func @transform_3(%arg0: i32) -> (i32, i32) {
    %c0_i32 = arith.constant 0 : i32
    %c0_i32_0 = arith.constant 0 : i32
    return %arg0, %c0_i32 : i32, i32
  }
  func.func @transform_4(%arg0: i32) -> (i32, i32) {
    %c0_i32 = arith.constant 0 : i32
    %c0_i32_0 = arith.constant 0 : i32
    return %arg0, %c0_i32 : i32, i32
  }
}

</mosaic_0001>

<bundles_post_ra>
// kernel: _lambda_.3
= control target key start
LH: loop header
LB: loop body
LE: loop exit
PB: predicated region body
PF: predicated region fallthrough
CT: control target
= control target key end

     0   :  { %v415_v3 = vmov 0   ;;  %s641_s0 = inlined_call_operand.vmem [shape: f32[1,128], index: 0, kind: input, shape index: {}]   ;;  %s642_s1 = inlined_call_operand.vmem [shape: f32[1,128], index: 1, kind: input, shape index: {}]   ;;  %s643_s2 = inlined_call_operand.vmem [shape: f32[64,1], index: 2, kind: input, shape index: {}]   ;;  %s644_s3 = inlined_call_operand.vmem [shape: f32[64,1], index: 3, kind: input, shape index: {}]   ;;  %s645_s4 = inlined_call_operand.hbm [shape: f32[64,128], index: 4, kind: output, shape index: {}]  }
   0x1   :  { %v24_v0 = vld [vmem:[%s643_s2 + $0x20] sm:$0xff]  ;;  %v22_v1 = vld [vmem:[%s643_s2 + $0x10] sm:$0xff]  ;;  %354 = vset.pattern.permute.xlu2 %v415_v3  ;;  %353 = vset.pattern.permute.xlu1 %v415_v3 }
   0x2   :  { %v20_v2 = vld [vmem:[%s643_s2] sm:$0xff]  ;;  %352 = vset.pattern.permute.xlu0 %v415_v3  ;;  %58 = vperm.xlu2 %354, %v24_v0  }
   0x3   :  { %48 = vperm.xlu1 %353, %v22_v1   ;;  %38 = vperm.xlu0 %352, %v20_v2  }
   0x4   :  { %9 = vsyncpa [#allocation3], 0  ;;  %v25_v4 = vld [vmem:[%s643_s2 + $0x28] sm:$0xff]  ;;  %v23_v5 = vld [vmem:[%s643_s2 + $0x18] sm:$0xff]  ;;  %s328_s25 = sshll.u32 %s645_s4, 4  ;;  %s417_s26 = smov 128   ;;  %s329_s25 = int_to_ptr.hbm [resolvable:$true] %s328_s25 }
   0x5   :  { %v21_v6 = vld [vmem:[%s643_s2 + $0x8] sm:$0xff]  ;;  %v28_v7 = vld [vmem:[%s644_s3] sm:$0xff]  ;;  %v27_v8 = vld [vmem:[%s643_s2 + $0x38] sm:$0xff]  ;;  %s418_s27 = smov 8  }
   0x6   :  { %v26_v9 = vld [vmem:[%s643_s2 + $0x30] sm:$0xff]  ;;  %v31_v10 = vld [vmem:[%s644_s3 + $0x18] sm:$0xff]  ;;  %v29_v12 = vld [vmem:[%s644_s3 + $0x8] sm:$0xff] }
   0x7   :  { %v30_v11 = vld [vmem:[%s644_s3 + $0x10] sm:$0xff]  ;;  %v33_v14 = vld [vmem:[%s644_s3 + $0x28] sm:$0xff]  ;;  %v32_v15 = vld [vmem:[%s644_s3 + $0x20] sm:$0xff] }
   0x8   :  { %v34_v13 = vld [vmem:[%s644_s3 + $0x30] sm:$0xff]  ;;  %v35_v16 = vld [vmem:[%s644_s3 + $0x38] sm:$0xff]  ;;  %v495_v17 = vld [vmem:[%s641_s0] ss:$0 sm:$0xff]  ;;  %s416_s0 = smov [#allocation2]  }
   0x9   :  { %v500_v18 = vld [vmem:[%s642_s1] ss:$0 sm:$0xff]  ;;  %s326_s1 = sshll.u32 %s416_s0, 4  ;;  %s327_s1 = int_to_ptr.vmem [resolvable:$true] %s326_s1 }
   0xa   :  { %63 = vperm.xlu2 %354, %v25_v4  }
   0xb   :  { %53 = vperm.xlu1 %353, %v23_v5   ;;  %43 = vperm.xlu0 %352, %v21_v6  }
  0x12   :  { %260 = vperm.xlu2 %354, %v28_v7  }
  0x13   :  { %73 = vperm.xlu1 %353, %v27_v8   ;;  %68 = vperm.xlu0 %352, %v26_v9  }
  0x1a   :  { %275 = vperm.xlu2 %354, %v31_v10  }
  0x1b   :  { %270 = vperm.xlu1 %353, %v30_v11   ;;  %265 = vperm.xlu0 %352, %v29_v12  }
  0x22   :  { %290 = vperm.xlu2 %354, %v34_v13  }
  0x23   :  { %285 = vperm.xlu1 %353, %v33_v14   ;;  %280 = vperm.xlu0 %352, %v32_v15  }
  0x2b   :  { %295 = vperm.xlu0 %352, %v35_v16  }
  0x5c   :  { %v59_v19 = vpop.permute.xlu2 %58 }
  0x5d   :  { %v503_v20 = vmul.f32 %v495_v17, %v59_v19 }
  0x5f   :  { %v94_v21 = vmul.f32 %v500_v18, %v503_v20 }
  0x61   :  { %v344_v22 = vmul.f32 -1.442695, %v94_v21 }
  0x63   :  { %357 = vpow2.f32 %v344_v22 }
  0x64   :  { %v64_v23 = vpop.permute.xlu2 %63 }
  0x65   :  { %v508_v24 = vmul.f32 %v495_v17, %v64_v23 }
  0x67   :  { %v95_v25 = vmul.f32 %v500_v18, %v508_v24 }
  0x69   :  { %v345_v26 = vmul.f32 -1.442695, %v95_v25  ;;  %v358_v27 = vpop.eup %357 }
  0x6a   :  { %v512_v28 = vadd.f32 1.0, %v358_v27 }
  0x6b   :  { %359 = vpow2.f32 %v345_v26 }
  0x6c   :  { %361 = vrcp.f32 %v512_v28  ;;  %vm195_vm2 = vweird.f32 %v512_v28  ;;  %v199_v2 = vand.u32 2147483647, %v512_v28  ;;  %v201_v3 = vand.u32 2147483648, %v512_v28 }
  0x6e   :  { %vm573_vm7 = vcmp.eq.f32.partialorder %v199_v2, 8.507059e+37  ;;  %v202_v19 = vor.u32 1.1754944e-38, %v201_v3 }
  0x71   :  { %v360_v29 = vpop.eup %359 }
  0x72   :  { %v127_v30 = vadd.f32 1.0, %v360_v29  ;;  %v525_v37 = vpop.eup %361 }
  0x73   :  { %v191_v42 = vmul.f32 %v525_v37, %v512_v28  ;;  %vm196_vm3 = vweird.f32 %v525_v37 }
  0x74   :  { %363 = vrcp.f32 %v127_v30  ;;  %vm210_vm0 = vweird.f32 %v127_v30  ;;  %v216_v59 = vand.u32 2147483648, %v127_v30  ;;  %v214_v63 = vand.u32 2147483647, %v127_v30  ;;  %vm563_vm5 = vmor %vm195_vm2, %vm196_vm3 }
  0x75   :  { %v49_v31 = vpop.permute.xlu1 %48  ;;  %v39_v32 = vpop.permute.xlu0 %38  ;;  %v192_v50 = vsub.f32 1.0, %v191_v42 }
  0x76   :  { %v516_v33 = vmul.f32 %v495_v17, %v49_v31  ;;  %v519_v34 = vmul.f32 %v495_v17, %v39_v32  ;;  %v217_v6 = vor.u32 1.1754944e-38, %v216_v59  ;;  %vm215_vm6 = vcmp.eq.f32.partialorder %v214_v63, 8.507059e+37 }
  0x77   :  { %v193_v58 = vmul.f32 %v525_v37, %v192_v50 }
  0x78   :  { %v92_v35 = vmul.f32 %v500_v18, %v516_v33  ;;  %v90_v36 = vmul.f32 %v500_v18, %v519_v34 }
  0x79   :  { %v194_v5 = vadd.f32 %v525_v37, %v193_v58 }
  0x7a   :  { %v364_v38 = vpop.eup %363  ;;  %v342_v39 = vmul.f32 -1.442695, %v92_v35  ;;  %v340_v40 = vmul.f32 -1.442695, %v90_v36 }
  0x7b   :  { %v206_v41 = vmul.f32 %v364_v38, %v127_v30  ;;  %vm211_vm1 = vweird.f32 %v364_v38  ;;  %v198_v23 = vsel %vm563_vm5, %v525_v37, %v194_v5  ;;  %v261_v37 = vpop.permute.xlu2 %260 }
  0x7c   :  { %365 = vpow2.f32 %v342_v39  ;;  %vm548_vm4 = vmor %vm210_vm0, %vm211_vm1 }
  0x7d   :  { %367 = vpow2.f32 %v340_v40  ;;  %v54_v43 = vpop.permute.xlu1 %53  ;;  %v44_v44 = vpop.permute.xlu0 %43  ;;  %v207_v45 = vsub.f32 1.0, %v206_v41  ;;  %v203_v40 = vsel %vm573_vm7, %v202_v19, %v198_v23  ;;  %v298_v41 = vmul.f32 %v495_v17, %v261_v37 }
  0x7e   :  { %v530_v46 = vmul.f32 %v495_v17, %v54_v43  ;;  %v533_v47 = vmul.f32 %v495_v17, %v44_v44  ;;  %v254_v19 = vmul.f32 %v203_v40, %v503_v20 }
  0x7f   :  { %v208_v52 = vmul.f32 %v364_v38, %v207_v45 }
  0x80   :  { %v93_v48 = vmul.f32 %v500_v18, %v530_v46  ;;  %v91_v49 = vmul.f32 %v500_v18, %v533_v47 }
  0x81   :  { %v209_v62 = vadd.f32 %v364_v38, %v208_v52 }
  0x82   :  { %v366_v51 = vpop.eup %365  ;;  %v343_v53 = vmul.f32 -1.442695, %v93_v48  ;;  %v341_v56 = vmul.f32 -1.442695, %v91_v49 }
  0x83   :  { %v368_v54 = vpop.eup %367  ;;  %v539_v55 = vadd.f32 1.0, %v366_v51  ;;  %v213_v10 = vsel %vm548_vm4, %v364_v38, %v209_v62  ;;  %v276_v23 = vpop.permute.xlu2 %275 }
  0x84   :  { %v541_v57 = vadd.f32 1.0, %v368_v54  ;;  %369 = vpow2.f32 %v343_v53  ;;  %v218_v25 = vsel %vm215_vm6, %v217_v6, %v213_v10 }
  0x85   :  { %371 = vrcp.f32 %v539_v55  ;;  %v74_v60 = vpop.permute.xlu1 %73  ;;  %v69_v61 = vpop.permute.xlu0 %68  ;;  %v169_v28 = vand.u32 2147483647, %v539_v55  ;;  %v171_v31 = vand.u32 2147483648, %v539_v55  ;;  %v255_v43 = vmul.f32 %v218_v25, %v508_v24 }
  0x86   :  { %373 = vrcp.f32 %v541_v57  ;;  %v553_v1 = vmul.f32 %v495_v17, %v74_v60  ;;  %v558_v4 = vmul.f32 %v495_v17, %v69_v61  ;;  %v139_v35 = vand.u32 2147483647, %v541_v57 }
  0x87   :  { %375 = vpow2.f32 %v341_v56  ;;  %v141_v39 = vand.u32 2147483648, %v541_v57  ;;  %vm165_vm10 = vweird.f32 %v539_v55  ;;  %vm170_vm12 = vcmp.eq.f32.partialorder %v169_v28, 8.507059e+37 }
  0x88   :  { %v97_v7 = vmul.f32 %v500_v18, %v553_v1  ;;  %v96_v11 = vmul.f32 %v500_v18, %v558_v4  ;;  %v172_v48 = vor.u32 1.1754944e-38, %v171_v31  ;;  %vm135_vm13 = vweird.f32 %v541_v57 }
  0x89   :  { %vm140_vm15 = vcmp.eq.f32.partialorder %v139_v35, 8.507059e+37  ;;  %v142_v51 = vor.u32 1.1754944e-38, %v141_v39 }
  0x8a   :  { %v370_v8 = vpop.eup %369  ;;  %v347_v14 = vmul.f32 -1.442695, %v97_v7  ;;  %v346_v30 = vmul.f32 -1.442695, %v96_v11 }
  0x8b   :  { %v372_v12 = vpop.eup %371  ;;  %v571_v13 = vadd.f32 1.0, %v370_v8 }
  0x8c   :  { %v374_v15 = vpop.eup %373  ;;  %v161_v21 = vmul.f32 %v372_v12, %v539_v55  ;;  %vm166_vm8 = vweird.f32 %v372_v12 }
  0x8d   :  { %v376_v22 = vpop.eup %375  ;;  %v131_v18 = vmul.f32 %v374_v15, %v541_v57  ;;  %377 = vrcp.f32 %v571_v13  ;;  %v271_v26 = vpop.permute.xlu1 %270  ;;  %vm136_vm9 = vweird.f32 %v374_v15  ;;  %vm167_vm11 = vmor %vm165_vm10, %vm166_vm8  ;;  %vm180_vm0 = vweird.f32 %v571_v13 }
  0x8e   :  { %v162_v27 = vsub.f32 1.0, %v161_v21  ;;  %v584_v29 = vadd.f32 1.0, %v376_v22  ;;  %379 = vpow2.f32 %v347_v14  ;;  %v588_v36 = vpop.permute.xlu0 %265  ;;  %vm137_vm14 = vmor %vm135_vm13, %vm136_vm9  ;;  %v186_v55 = vand.u32 2147483648, %v571_v13 }
  0x8f   :  { %v132_v32 = vsub.f32 1.0, %v131_v18  ;;  %v184_v63 = vand.u32 2147483647, %v571_v13  ;;  %v300_v6 = vmul.f32 %v495_v17, %v271_v26  ;;  %v301_v26 = vmul.f32 %v495_v17, %v276_v23 }
  0x90   :  { %v163_v38 = vmul.f32 %v372_v12, %v162_v27  ;;  %381 = vrcp.f32 %v584_v29  ;;  %v187_v7 = vor.u32 1.1754944e-38, %v186_v55  ;;  %v156_v11 = vand.u32 2147483648, %v584_v29 }
  0x91   :  { %v133_v42 = vmul.f32 %v374_v15, %v132_v32  ;;  %383 = vpow2.f32 %v346_v30  ;;  %v154_v16 = vand.u32 2147483647, %v584_v29  ;;  %vm185_vm4 = vcmp.eq.f32.partialorder %v184_v63, 8.507059e+37 }
  0x92   :  { %v164_v44 = vadd.f32 %v372_v12, %v163_v38  ;;  %vm150_vm5 = vweird.f32 %v584_v29  ;;  %v157_v28 = vor.u32 1.1754944e-38, %v156_v11  ;;  %v299_v39 = vmul.f32 %v495_v17, %v588_v36 }
  0x93   :  { %v378_v45 = vpop.eup %377  ;;  %v134_v49 = vadd.f32 %v374_v15, %v133_v42  ;;  %vm155_vm7 = vcmp.eq.f32.partialorder %v154_v16, 8.507059e+37 }
  0x94   :  { %v168_v50 = vsel %vm167_vm11, %v372_v12, %v164_v44  ;;  %v176_v52 = vmul.f32 %v378_v45, %v571_v13  ;;  %v380_v53 = vpop.eup %379  ;;  %vm181_vm1 = vweird.f32 %v378_v45 }
  0x95   :  { %v173_v54 = vsel %vm170_vm12, %v172_v48, %v168_v50  ;;  %v138_v24 = vsel %vm137_vm14, %v374_v15, %v134_v49  ;;  %v286_v56 = vpop.permute.xlu1 %285  ;;  %v602_v57 = vadd.f32 1.0, %v380_v53  ;;  %vm182_vm2 = vmor %vm180_vm0, %vm181_vm1 }
  0x96   :  { %v382_v58 = vpop.eup %381  ;;  %v252_v59 = vmul.f32 %v173_v54, %v516_v33  ;;  %v143_v60 = vsel %vm140_vm15, %v142_v51, %v138_v24  ;;  %v177_v61 = vsub.f32 1.0, %v176_v52  ;;  %v303_v2 = vmul.f32 %v495_v17, %v286_v56  ;;  %v281_v10 = vpop.permute.xlu0 %280 }
  0x97   :  { %v250_v62 = vmul.f32 %v143_v60, %v519_v34  ;;  %v146_v0 = vmul.f32 %v382_v58, %v584_v29  ;;  %v384_v3 = vpop.eup %383  ;;  %385 = vrcp.f32 %v602_v57  ;;  %vm151_vm3 = vweird.f32 %v382_v58  ;;  %v291_v54 = vpop.permute.xlu2 %290 }
  0x98   :  { %v178_v5 = vmul.f32 %v378_v45, %v177_v61  ;;  %v610_v9 = vadd.f32 1.0, %v384_v3  ;;  %v308_v12 = vadd.f32 %v300_v6, %v252_v59  ;;  %v311_v14 = vadd.f32 %v303_v2, %v255_v43  ;;  %vm152_vm6 = vmor %vm150_vm5, %vm151_vm3 }
  0x99   :  { %v306_v33 = vadd.f32 %v298_v41, %v250_v62  ;;  %v147_v8 = vsub.f32 1.0, %v146_v0  ;;  %v302_v22 = vmul.f32 %v495_v17, %v281_v10  ;;  %v244_v42 = vand.u32 2147483647, %v602_v57 }
  0x9a   :  { %v179_v34 = vadd.f32 %v378_v45, %v178_v5  ;;  %387 = vrcp.f32 %v610_v9  ;;  %316 = vst [vmem:[#allocation2 + $0x10] sm:$0xff] %v308_v12  ;;  %vm240_vm9 = vweird.f32 %v602_v57  ;;  %v229_v49 = vand.u32 2147483647, %v610_v9 }
  0x9b   :  { %314 = vst [vmem:[#allocation2] sm:$0xff] %v306_v33  ;;  %v148_v15 = vmul.f32 %v382_v58, %v147_v8  ;;  %v310_v20 = vadd.f32 %v302_v22, %v254_v19  ;;  %vm245_vm12 = vcmp.eq.f32.partialorder %v244_v42, 8.507059e+37  ;;  %vm225_vm13 = vweird.f32 %v610_v9 }
  0x9c   :  { %v183_v21 = vsel %vm182_vm2, %v378_v45, %v179_v34  ;;  %319 = vst [vmem:[#allocation2 + $0x28] sm:$0xff] %v311_v14  ;;  %vm230_vm15 = vcmp.eq.f32.partialorder %v229_v49, 8.507059e+37  ;;  %v304_v61 = vmul.f32 %v495_v17, %v291_v54 }
  0x9d   :  { %v188_v25 = vsel %vm185_vm4, %v187_v7, %v183_v21  ;;  %v149_v18 = vadd.f32 %v382_v58, %v148_v15  ;;  %v386_v13 = vpop.eup %385  ;;  %318 = vst [vmem:[#allocation2 + $0x20] sm:$0xff] %v310_v20 }
  0x9e   :  { %v253_v27 = vmul.f32 %v188_v25, %v530_v46  ;;  %v236_v31 = vmul.f32 %v386_v13, %v602_v57  ;;  %v246_v46 = vand.u32 2147483648, %v602_v57  ;;  %vm241_vm8 = vweird.f32 %v386_v13  ;;  %v296_v50 = vpop.permute.xlu0 %295 }
  0x9f   :  { %v153_v30 = vsel %vm152_vm6, %v382_v58, %v149_v18  ;;  %vm242_vm10 = vmor %vm240_vm9, %vm241_vm8  ;;  %v305_v56 = vmul.f32 %v495_v17, %v296_v50 }
  0xa0   :  { %v309_v32 = vadd.f32 %v301_v26, %v253_v27  ;;  %v158_v35 = vsel %vm155_vm7, %v157_v28, %v153_v30  ;;  %v388_v37 = vpop.eup %387  ;;  %v237_v38 = vsub.f32 1.0, %v236_v31  ;;  %v247_v48 = vor.u32 1.1754944e-38, %v246_v46 }
  0xa1   :  { %v251_v29 = vmul.f32 %v158_v35, %v533_v47  ;;  %v221_v40 = vmul.f32 %v388_v37, %v610_v9  ;;  %v231_v47 = vand.u32 2147483648, %v610_v9  ;;  %vm226_vm11 = vweird.f32 %v388_v37 }
  0xa2   :  { %317 = vst [vmem:[#allocation2 + $0x18] sm:$0xff] %v309_v32  ;;  %v238_v41 = vmul.f32 %v386_v13, %v237_v38  ;;  %vm227_vm14 = vmor %vm225_vm13, %vm226_vm11 }
  0xa3   :  { %v307_v43 = vadd.f32 %v299_v39, %v251_v29  ;;  %v222_v44 = vsub.f32 1.0, %v221_v40  ;;  %v232_v55 = vor.u32 1.1754944e-38, %v231_v47 }
  0xa4   :  { %v239_v45 = vadd.f32 %v386_v13, %v238_v41 }
  0xa5   :  { %315 = vst [vmem:[#allocation2 + $0x8] sm:$0xff] %v307_v43  ;;  %v223_v36 = vmul.f32 %v388_v37, %v222_v44 }
  0xa6   :  { %v243_v51 = vsel %vm242_vm10, %v386_v13, %v239_v45 }
  0xa7   :  { %v248_v52 = vsel %vm245_vm12, %v247_v48, %v243_v51  ;;  %v224_v53 = vadd.f32 %v388_v37, %v223_v36 }
  0xa8   :  { %v257_v24 = vmul.f32 %v248_v52, %v553_v1 }
  0xa9   :  { %v228_v58 = vsel %vm227_vm14, %v388_v37, %v224_v53 }
  0xaa   :  { %v233_v59 = vsel %vm230_vm15, %v232_v55, %v228_v58  ;;  %v313_v60 = vadd.f32 %v305_v56, %v257_v24 }
  0xab   :  { %v256_v57 = vmul.f32 %v233_v59, %v558_v4 }
  0xac   :  { %321 = vst [vmem:[#allocation2 + $0x38] sm:$0xff] %v313_v60 }
  0xad   :  { %v312_v1 = vadd.f32 %v304_v61, %v256_v57 }
  0xaf   :  { %320 = vst [vmem:[#allocation2 + $0x30] sm:$0xff] %v312_v1 }
  0xb0   :  { %334 = dma.vmem_to_hbm [thread:$0]  %s327_s1, 1024, %s329_s25, [#allocation3], %s417_s26, %s417_s26, %s418_s27  }
  0xb1   :  { %413 = dma.done.wait [#allocation3], 1024  }
  0xb2   :  { %414 = vsyncadd [#allocation3], 4294966272 }
  0xb3   :  { %339 = vsyncpa [#allocation3], 1 }

// kernel: _lambda_.2
= control target key start
LH: loop header
LB: loop body
LE: loop exit
PB: predicated region body
PF: predicated region fallthrough
CT: control target
= control target key end

     0   :  { %vm30_vm0 = vcmask 523264   ;;  %vm57_vm1 = vcmask 130048   ;;  %vm81_vm2 = vcmask 516096   ;;  %v147_v18 = vmov 64.0   ;;  %s223_s1 = inlined_call_operand.vmem [shape: f32[64,16], index: 1, kind: input, shape index: {}]   ;;  %s224_s0 = inlined_call_operand.vmem [shape: f32[1,64], index: 0, kind: input, shape index: {}]   ;;  %s225_s3 = inlined_call_operand.vmem [shape: f32[16,64], index: 3, kind: input, shape index: {}]   ;;  %s226_s2 = inlined_call_operand.vmem [shape: f32[1,16], index: 2, kind: input, shape index: {}]   ;;  %s227_s4 = inlined_call_operand.vmem [shape: f32[1,64], index: 4, kind: input, shape index: {}]   ;;  %s228_s5 = inlined_call_operand.vmem [shape: f32[1,64], index: 5, kind: output, shape index: {}]  }
   0x1   :  { %v28_v0 = vld [vmem:[%s223_s1 + $0x38] sm:$0xff]  ;;  %v27_v1 = vld [vmem:[%s223_s1 + $0x30] sm:$0xff]  ;;  %v26_v2 = vld [vmem:[%s223_s1 + $0x28] sm:$0xff]  ;;  %139 = vrcp.f32 %v147_v18 }
   0x2   :  { %42 = vmatpush.msra.mxu0 %v28_v0  ;;  %v25_v3 = vld [vmem:[%s223_s1 + $0x20] sm:$0xff]  ;;  %v24_v4 = vld [vmem:[%s223_s1 + $0x18] sm:$0xff]  ;;  %v23_v5 = vld [vmem:[%s223_s1 + $0x10] sm:$0xff] }
   0x3   :  { %v22_v6 = vld [vmem:[%s223_s1 + $0x8] sm:$0xff]  ;;  %v21_v7 = vld [vmem:[%s223_s1] sm:$0xff] }
   0x4   :  { %43 = vmatpush.msra.mxu0 %v27_v1  ;;  %v20_v8 = vld [vmem:[%s224_s0] sm:$0x1]  ;;  %v55_v9 = vld [vmem:[%s225_s3 + $0x8] sm:$0xff] }
   0x5   :  { %75 = vmatpush.msra.mxu1 %v55_v9  ;;  %v54_v10 = vld [vmem:[%s225_s3] sm:$0xff] }
   0x6   :  { %44 = vmatpush.msra.mxu0 %v26_v2  ;;  %v29_v11 = vld [vmem:[%s226_s2] sm:$0x1] }
   0x7   :  { %76 = vmatpush.msra.mxu1 %v54_v10  ;;  %v56_v14 = vld [vmem:[%s227_s4] sm:$0x1]  ;;  %v140_v19 = vpop.eup %139 }
   0x8   :  { %45 = vmatpush.msra.mxu0 %v25_v3  ;;  %v86_v20 = vmul.f32 64.0, %v140_v19  ;;  %vm90_vm3 = vweird.f32 %v140_v19 }
   0xa   :  { %46 = vmatpush.msra.mxu0 %v24_v4  ;;  %v87_v21 = vsub.f32 1.0, %v86_v20 }
   0xc   :  { %47 = vmatpush.msra.mxu0 %v23_v5  ;;  %v88_v22 = vmul.f32 %v140_v19, %v87_v21 }
   0xe   :  { %48 = vmatpush.msra.mxu0 %v22_v6  ;;  %v89_v23 = vadd.f32 %v140_v19, %v88_v22 }
  0x10   :  { %49 = vmatpush.msra.mxu0 %v21_v7  ;;  %v91_v24 = vsel %vm90_vm3, %v140_v19, %v89_v23 }
  0x11   :  { %135 = vmatmul.msk.f32.vlgmr.msra.gmra.mxu0 %vm30_vm0, %v20_v8 }
  0x8e   :  { %v51_v12 = vpop.f32.mrf.mxu0 }
  0x8f   :  { %v52_v13 = vadd.f32 %v51_v12, %v29_v11 }
  0x91   :  { %136 = vmatmul.msk.f32.vlgmr.msra.gmra.mxu1 %vm57_vm1, %v52_v13 }
 0x10e   :  { %v78_v15 = vpop.f32.mrf.mxu1 }
 0x10f   :  { %v79_v16 = vadd.f32 %v78_v15, %v56_v14 }
 0x111   :  { %v82_v17 = vsel %vm81_vm2, %v79_v16, 0.0 }
 0x112   :  { %83 = vadd.xlane.f32.xlu0 %v82_v17 }
 0x185   :  { %v84_v25 = vpop.xlane.xlu0 %83 }
 0x186   :  { %v92_v26 = vmul.f32 %v91_v24, %v84_v25 }
 0x188   :  { %v93_v27 = vsub.f32 %v79_v16, %v92_v26 }
 0x18a   :  { %v94_v28 = vmul.f32 %v93_v27, %v93_v27 }
 0x18c   :  { %v95_v29 = vsel %vm81_vm2, %v94_v28, 0.0 }
 0x18d   :  { %96 = vadd.xlane.f32.xlu0 %v95_v29 }
 0x200   :  { %v97_v30 = vpop.xlane.xlu0 %96 }
 0x201   :  { %v98_v31 = vmul.f32 %v97_v30, %v91_v24 }
 0x203   :  { %v99_v32 = vadd.f32 1e-05, %v98_v31 }
 0x205   :  { %141 = vrsqrt.f32 %v99_v32  ;;  %vm106_vm5 = vweird.f32 %v99_v32 }
 0x20b   :  { %v142_v33 = vpop.eup %141 }
 0x20c   :  { %v101_v34 = vmul.f32 %v142_v33, %v99_v32  ;;  %vm107_vm4 = vweird.f32 %v142_v33 }
 0x20d   :  { %vm108_vm6 = vmor %vm106_vm5, %vm107_vm4 }
 0x20e   :  { %v102_v35 = vmul.f32 %v142_v33, %v101_v34 }
 0x210   :  { %v103_v36 = vmul.f32 0.5, %v102_v35 }
 0x212   :  { %v104_v37 = vsub.f32 1.5, %v103_v36 }
 0x214   :  { %v105_v38 = vmul.f32 %v142_v33, %v104_v37 }
 0x216   :  { %v109_v39 = vsel %vm108_vm6, %v142_v33, %v105_v38 }
 0x217   :  { %v110_v40 = vmul.f32 %v109_v39, %v93_v27 }
 0x219   :  { %v137_v41 = vmul.f32 -1.442695, %v110_v40 }
 0x21b   :  { %143 = vpow2.f32 %v137_v41 }
 0x221   :  { %v144_v42 = vpop.eup %143 }
 0x222   :  { %v114_v43 = vadd.f32 1.0, %v144_v42 }
 0x224   :  { %145 = vrcp.f32 %v114_v43  ;;  %v126_v47 = vand.u32 2147483648, %v114_v43  ;;  %v124_v49 = vand.u32 2147483647, %v114_v43  ;;  %vm120_vm8 = vweird.f32 %v114_v43 }
 0x226   :  { %v127_v51 = vor.u32 1.1754944e-38, %v126_v47  ;;  %vm125_vm10 = vcmp.eq.f32.partialorder %v124_v49, 8.507059e+37 }
 0x22a   :  { %v146_v44 = vpop.eup %145 }
 0x22b   :  { %v116_v45 = vmul.f32 %v146_v44, %v114_v43  ;;  %vm121_vm7 = vweird.f32 %v146_v44 }
 0x22c   :  { %vm122_vm9 = vmor %vm120_vm8, %vm121_vm7 }
 0x22d   :  { %v117_v46 = vsub.f32 1.0, %v116_v45 }
 0x22f   :  { %v118_v48 = vmul.f32 %v146_v44, %v117_v46 }
 0x231   :  { %v119_v50 = vadd.f32 %v146_v44, %v118_v48 }
 0x233   :  { %v123_v52 = vsel %vm122_vm9, %v146_v44, %v119_v50 }
 0x234   :  { %v128_v53 = vsel %vm125_vm10, %v127_v51, %v123_v52 }
 0x235   :  { %130 = vst.msk [vmem:[%s228_s5] sm:$0x1] %vm81_vm2, %v128_v53 }

</bundles_post_ra>
